<compile_context>
chip_gen: v7x
topology: tpu7x:2x2x1
jax: 0.10.0
libtpu: 0.0.40
codegen_flags: <defaults>
</compile_context>

<pallas_src>
import functools

import jax
import jax.numpy as jnp
from jax import lax
from jax.experimental import pallas as pl
from jax.experimental.pallas import tpu as pltpu


def adl_kernel(binary_ref, x_ref, o_ref, *, drop_thr, channel_axis):
    """One block = `bt` whole (C, HW) feature maps; channel_axis is 1 or 2."""
    x = x_ref[...]                                       # (bt, d1, d2), input dtype

    # Per-element channel mean, accumulated in f32 (only the small map is f32).
    attention = jnp.mean(x, axis=channel_axis, keepdims=True, dtype=jnp.float32)

    # Per-batch-element max over the remaining (spatial) axes.
    max_val = jnp.max(attention, axis=(1, 2), keepdims=True)    # (bt, 1, 1)
    thr_val = max_val * drop_thr

    # Compute only the branch selected by the global binary scalar.
    binary = binary_ref[0]                               # f32 scalar in {0., 1.}
    selected_map = lax.cond(
        binary > 0.5,
        lambda a: (a < thr_val).astype(jnp.float32),     # drop-mask branch
        lambda a: jax.nn.sigmoid(a),                     # importance-map branch
        attention)

    # Big multiply stays in the input dtype (bf16-native VPU on v6e/v7x).
    o_ref[...] = (x * selected_map.astype(x.dtype)).astype(o_ref.dtype)


def _prefer_hw_on_lanes(C, HW):
    hw_dense = HW % 128 == 0
    c_dense = C % 128 == 0
    if hw_dense != c_dense:
        return hw_dense
    return HW >= C          # neither (or both) lane-dense: larger axis on lanes


def _choose_batch_tile(B, per_elem_bytes, target_bytes=4 * 1024 * 1024):
    divisors = [d for d in range(1, B + 1) if B % d == 0]
    fits = [d for d in divisors if d * per_elem_bytes <= target_bytes] or [1]
    # Prefer >= 2 grid steps so both v7x TensorCores get balanced work.
    multi = [d for d in fits if B // d >= 2]
    return max(multi) if multi else max(fits)


def adl_forward(x, binary_tensor, *, drop_thr=0.8, training=True):
    """ADL forward. x: (B, C, H, W). Matches the PyTorch module's training mode."""
    if not training:
        return x

    B, C, H, W = x.shape
    HW = H * W
    hw_on_lanes = _prefer_hw_on_lanes(C, HW)

    if hw_on_lanes:
        x3 = x.reshape(B, C, HW)                               # lanes = HW
        channel_axis = 1
    else:
        x3 = jnp.transpose(x.reshape(B, C, HW), (0, 2, 1))     # lanes = C
        channel_axis = 2

    d1, d2 = int(x3.shape[1]), int(x3.shape[2])
    per_elem_bytes = d1 * d2 * x3.dtype.itemsize
    bt = _choose_batch_tile(B, per_elem_bytes)
    grid = (B // bt,)

    binary = jnp.reshape(binary_tensor, (1,)).astype(jnp.float32)

    out = pl.pallas_call(
        functools.partial(adl_kernel, drop_thr=float(drop_thr),
                          channel_axis=channel_axis),
        out_shape=jax.ShapeDtypeStruct((B, d1, d2), x.dtype),
        grid_spec=pltpu.PrefetchScalarGridSpec(
            num_scalar_prefetch=0,
            grid=grid,
            in_specs=[
                pl.BlockSpec(memory_space=pltpu.SMEM),             # binary scalar
                pl.BlockSpec((bt, d1, d2), lambda b: (b, 0, 0)),   # x block
            ],
            out_specs=pl.BlockSpec((bt, d1, d2), lambda b: (b, 0, 0)),
        ),
        compiler_params=pltpu.CompilerParams(
            dimension_semantics=("parallel",),
            vmem_limit_bytes=64 * 1024 * 1024,
        ),
    )(binary, x3)

    if hw_on_lanes:
        return out.reshape(B, C, H, W)
    return jnp.transpose(out, (0, 2, 1)).reshape(B, C, H, W)


def adl_reference(x, binary_tensor, *, drop_thr=0.8):
    """Pure-JAX reference mirroring the PyTorch forward (training mode)."""
    b = x.shape[0]
    attention = jnp.mean(x.astype(jnp.float32), axis=1, keepdims=True)
    importance_map = jax.nn.sigmoid(attention)
    max_val = jnp.max(attention.reshape(b, -1), axis=1, keepdims=True)
    thr_val = (max_val * drop_thr).reshape(b, 1, 1, 1)
    drop_mask = (attention < thr_val).astype(jnp.float32)
    binary = binary_tensor.astype(jnp.float32)
    selected_map = (1.0 - binary) * importance_map + binary * drop_mask
    return (x * selected_map.astype(x.dtype)).astype(x.dtype)


if __name__ == "__main__":
    drop_rate = 0.75
    drop_thr = 0.8

    key = jax.random.PRNGKey(0)
    kx, kr, kx2 = jax.random.split(key, 3)

    # Primary shape from the module: HW = 256 -> HW on lanes, batch-packed grid.
    B, C, H, W = 2, 4, 16, 16
    x = jax.random.normal(kx, (B, C, H, W), dtype=jnp.float32)

    # binary_tensor = floor(rand([]) + drop_rate), same as the PyTorch module.
    random_tensor = jax.random.uniform(kr, (), dtype=jnp.float32) + drop_rate
    binary_tensor = jnp.floor(random_tensor)

    out = jax.block_until_ready(adl_forward(x, binary_tensor, drop_thr=drop_thr))
    ref = adl_reference(x, binary_tensor, drop_thr=drop_thr)
    assert out.shape == (B, C, H, W)
    assert jnp.allclose(out, ref, atol=1e-5, rtol=1e-5), "mismatch vs reference"

    # Exercise both branches of the binary selector explicitly.
    for b_val in (0.0, 1.0):
        bsel = jnp.asarray(b_val, dtype=jnp.float32)
        o = jax.block_until_ready(adl_forward(x, bsel, drop_thr=drop_thr))
        r = adl_reference(x, bsel, drop_thr=drop_thr)
        assert jnp.allclose(o, r, atol=1e-5, rtol=1e-5), "branch mismatch"

    # Exercise the channels-on-lanes layout (HW not a multiple of 128).
    B2, C2, H2, W2 = 2, 128, 4, 4
    x2 = jax.random.normal(kx2, (B2, C2, H2, W2), dtype=jnp.float32)
    o2 = jax.block_until_ready(adl_forward(x2, binary_tensor, drop_thr=drop_thr))
    r2 = adl_reference(x2, binary_tensor, drop_thr=drop_thr)
    assert o2.shape == (B2, C2, H2, W2)
    assert jnp.allclose(o2, r2, atol=1e-5, rtol=1e-5), "transposed-layout mismatch"

    print("KERNEL_OK")
</pallas_src>

<mosaic_0001>
module attributes {stable_mosaic.version = 11 : i64} {
  func.func @adl_kernel(%arg0: i32, %arg1: memref<1xf32, #tpu.memory_space<smem>>, %arg2: memref<1x4x256xf32, #tpu.memory_space<vmem>>, %arg3: memref<1x4x256xf32, #tpu.memory_space<vmem>>) attributes {dimension_semantics = [#tpu.dimension_semantics<parallel>], iteration_bounds = array<i64: 2>, scalar_prefetch = 0 : i64, scratch_operands = 0 : i64, tpu.core_type = #tpu.core_type<tc>, window_params = [{transform_indices = @transform_0, window_bounds = array<i64: 1>}, {transform_indices = @transform_1, window_bounds = array<i64: 1, 4, 256>}, {transform_indices = @transform_2, window_bounds = array<i64: 1, 4, 256>}]} {
    %c0 = arith.constant 0 : index
    %c0_0 = arith.constant 0 : index
    %c0_1 = arith.constant 0 : index
    %0 = vector.load %arg2[%c0, %c0_0, %c0_1] : memref<1x4x256xf32, #tpu.memory_space<vmem>>, vector<1x4x256xf32>
    %cst = arith.constant dense<0.000000e+00> : vector<1x256xf32>
    %1 = vector.multi_reduction <add>, %0, %cst [1] : vector<1x4x256xf32> to vector<1x256xf32>
    %2 = vector.shape_cast %1 : vector<1x256xf32> to vector<1x1x256xf32>
    %cst_2 = arith.constant 4.000000e+00 : f32
    %3 = vector.broadcast %cst_2 : f32 to vector<1x1x256xf32>
    %4 = arith.divf %2, %3 : vector<1x1x256xf32>
    %cst_3 = arith.constant dense<0xFF800000> : vector<1xf32>
    %5 = vector.multi_reduction <maximumf>, %4, %cst_3 [1, 2] : vector<1x1x256xf32> to vector<1xf32>
    %6 = vector.shape_cast %5 : vector<1xf32> to vector<1x1x1xf32>
    %cst_4 = arith.constant 8.000000e-01 : f32
    %7 = vector.broadcast %cst_4 : f32 to vector<1x1x1xf32>
    %8 = arith.mulf %6, %7 : vector<1x1x1xf32>
    %c0_5 = arith.constant 0 : index
    %9 = memref.load %arg1[%c0_5] : memref<1xf32, #tpu.memory_space<smem>>
    %cst_6 = arith.constant 5.000000e-01 : f32
    %10 = arith.cmpf ogt, %9, %cst_6 : f32
    %11 = arith.extui %10 : i1 to i32
    %c0_i32 = arith.constant 0 : i32
    %12 = arith.cmpi ne, %11, %c0_i32 : i32
    %13 = scf.if %12 -> (vector<1x1x256xf32>) {
      %17 = vector.broadcast %8 : vector<1x1x1xf32> to vector<1x1x256xf32>
      %18 = arith.cmpf olt, %4, %17 : vector<1x1x256xf32>
      %19 = arith.extui %18 : vector<1x1x256xi1> to vector<1x1x256xi32>
      %20 = arith.sitofp %19 : vector<1x1x256xi32> to vector<1x1x256xf32>
      scf.yield %20 : vector<1x1x256xf32>
    } else {
      %17 = arith.negf %4 : vector<1x1x256xf32>
      %18 = math.exp %17 : vector<1x1x256xf32>
      %cst_10 = arith.constant 1.000000e+00 : f32
      %19 = vector.broadcast %cst_10 : f32 to vector<1x1x256xf32>
      %20 = arith.addf %19, %18 : vector<1x1x256xf32>
      %21 = arith.divf %19, %20 : vector<1x1x256xf32>
      scf.yield %21 : vector<1x1x256xf32>
    }
    %14 = vector.broadcast %13 : vector<1x1x256xf32> to vector<1x4x256xf32>
    %15 = arith.mulf %0, %14 : vector<1x4x256xf32>
    %c0_7 = arith.constant 0 : index
    %c0_8 = arith.constant 0 : index
    %c0_9 = arith.constant 0 : index
    %16 = vector.load %arg3[%c0_7, %c0_8, %c0_9] : memref<1x4x256xf32, #tpu.memory_space<vmem>>, vector<1x4x256xf32>
    tpu.vector_store %arg3[%c0_7, %c0_8, %c0_9], %15 {strides = array<i32>} : memref<1x4x256xf32, #tpu.memory_space<vmem>>, vector<1x4x256xf32>,
    return
  }
  func.func @transform_0(%arg0: i32) -> i32 {
    %c0_i32 = arith.constant 0 : i32
    %c0_i32_0 = arith.constant 0 : i32
    return %c0_i32 : i32
  }
  func.func @transform_1(%arg0: i32) -> (i32, i32, i32) {
    %c0_i32 = arith.constant 0 : i32
    %c0_i32_0 = arith.constant 0 : i32
    %c0_i32_1 = arith.constant 0 : i32
    return %arg0, %c0_i32, %c0_i32_0 : i32, i32, i32
  }
  func.func @transform_2(%arg0: i32) -> (i32, i32, i32) {
    %c0_i32 = arith.constant 0 : i32
    %c0_i32_0 = arith.constant 0 : i32
    %c0_i32_1 = arith.constant 0 : i32
    return %arg0, %c0_i32, %c0_i32_0 : i32, i32, i32
  }
}

</mosaic_0001>

<bundles_post_ra>
// kernel: tpu_custom_call.1
= control target key start
LH: loop header
LB: loop body
LE: loop exit
PB: predicated region body
PF: predicated region fallthrough
CT: control target
= control target key end

     0   :  { %s694_s0 = inlined_call_operand.<no memory space> [shape: f32[1], index: 0, kind: input, shape index: {}]   ;;  %s695_s1 = inlined_call_operand.hbm [shape: f32[2,4,256], index: 1, kind: input, shape index: {}]   ;;  %s696_s2 = inlined_call_operand.hbm [shape: f32[2,4,256], index: 2, kind: output, shape index: {}]  }
   0x1   :  { %7 = sst [smem:[#allocation2]] %s694_s0 }
   0x2   :  { %8 = vsyncpa [#allocation4], 0 }
   0x3   :  { %10 = vsyncpa [#allocation4 + $0x1], 0 }
   0x4   :  { %11 = vsyncpa [#allocation5], 0 }
   0x5   :  { %13 = vsyncpa [#allocation5 + $0x1], 0  ;;  %s522_s11 = smov 0   ;;  %s524_s12 = smov 0  }
   0x6   :  { %s526_s13 = smov 0   ;;  %s528_s14 = smov 0  }
   0x7 LB: > { %s543_s0 = sadd.s32 4294967295, %s499_s14   ;;  %s308_s15 = sadd.s32 4294967294, %s499_s14   ;;  %s499_s14 = sphi %s528_s14, %s711_s14   ;;  %s495_s13 = sphi %s526_s13, %s710_s13   ;;  %s491_s12 = sphi %s524_s12, %s709_s12   ;;  %s487_s11 = sphi %s522_s11, %s708_s11  }
   0x8   : > { %s547_s16 = sadd.s32 1, %s499_s14   ;;  %s47_s17 = sadd.s32 1, %s495_s13 }
   0x9   : > { %s44_s18 = ssub.s32 %s499_s14, %s547_s16  ;;  %p54_p0 = scmp.ne.s32.totalorder %s495_s13, %s491_s12 }
   0xa   : > { %p45_p1 = scmp.eq.s32.totalorder %s44_s18, 0  ;;  %p55_p2 = scmp.eq.s32.totalorder %s499_s14, 0 }
   0xb   : > { %p60_p3 = scmp.ne.s32.totalorder %s491_s12, %s487_s11  ;;  %p61_p4 = scmp.eq.s32.totalorder %s543_s0, 0 }
   0xc   : > { %s559_s19 = scalar_select %p45_p1, %s495_s13, %s47_s17  }
   0xd   : > { %p561_p5 = por %p55_p2, %p54_p0  ;;  %p565_p6 = por %p61_p4, %p60_p3 }
   0xe   : > { %p84_p7 = scmp.eq.s32.totalorder %s543_s0, 1  ;;  %p90_p8 = scmp.eq.s32.totalorder %s308_s15, 1 }
   0xf   : > { %p357_p10 = scmp.lt.s32.totalorder %s499_s14, 2  ;;  %s113_s24 = sand.u32 1, %s495_s13  }
  0x10   : > { %p572_p11 = por %p84_p7, %p54_p0  ;;  %p576_p12 = por %p90_p8, %p60_p3 }
  0x11   : > { %s326_s25 = sshll.u32 %s499_s14, 7  ;;  %s311_s26 = sshll.u32 %s113_s24, 3 }
  0x12   : > { %s700_s22 = scalar_select %p572_p11, 1, 0 }
  0x13   : > { %s701_s23 = scalar_select %p576_p12, 1, 0 }
  0x14   : > { %s585_s29 = scalar_lea.hbm %s695_s1, %s326_s25  ;;  %s117_s30 = scalar_lea.vmem [#allocation3], %s311_s26 }
  0x15   : > { %s125_s3 = sshll.u32 %s117_s30, 4  ;;  %p589_p13 = pnand %p357_p10, %p561_p5  ;;  %s593_s3 = int_to_ptr.vmem [resolvable:$true] %s125_s3 }
  0x16   : > { %s114_s5 = scalar_lea.sflag [#allocation4], %s113_s24  ;;  %s403_s6 = scalar_lea.hbm %s585_s29, 128 }
  0x17   : > { %p404_p2 = scmp.ne.s32.totalorder %s585_s29, %s403_s6  ;;  %p405_p3 = pneg %p589_p13 }
  0x18   : > { %s408_s9 = scalar_lea.hbm %s695_s1, 256  ;;  %p409_p5 = scmp.lt.u32.totalorder %s585_s29, %s695_s1 }
  0x19   : > { %p406_p4 = pnand %p405_p3, %p404_p2  ;;  %p410_p8 = scmp.lt.u32.totalorder %s408_s9, %s403_s6 }
  0x1a   : > { %p412_p9 = scmp.lt.u32.totalorder %s403_s6, %s585_s29 }
  0x1b   : > { %p407_p7 = pneg %p406_p4  ;;  %p411_p10 = por %p410_p8, %p409_p5 }
  0x1d   : > { %p413_p0 = por %p412_p9, %p411_p10 }
  0x1f   : > { %p414_p1 = pnand %p413_p0, %p407_p7 }
  0x21   : > { %417 = shalt.err (!%p414_p1)
}
  0x22   : > { %s418_s17 = scalar_lea.vmem %s593_s3, 128  ;;  %s501_s18 = smov [#allocation3]  }
  0x23   : > { %p419_p2 = scmp.ne.s32.totalorder %s593_s3, %s418_s17  ;;  %s423_s20 = sshll.u32 %s501_s18, 4  ;;  %s424_s20 = int_to_ptr.vmem [resolvable:$false] %s423_s20 }
  0x24   : > { %s425_s24 = scalar_lea.vmem %s424_s20, 256  ;;  %p426_p11 = scmp.lt.s32.totalorder %s593_s3, %s424_s20 }
  0x25   : > { %p421_p4 = pnand %p419_p2, %p405_p3  ;;  %p427_p5 = scmp.lt.s32.totalorder %s425_s24, %s418_s17 }
  0x27   : > { %p422_p12 = pneg %p421_p4  ;;  %p428_p8 = por %p427_p5, %p426_p11 }
  0x29   : > { %p429_p9 = pnand %p428_p8, %p422_p12 }
  0x2b   : > { %432 = shalt.err (!%p429_p9)
}
  0x2c   : > { %352 = dma.hbm_to_vmem [thread:$0]  (!%p589_p13), %s585_s29, 128, %s593_s3, %s114_s5  }
  0x2d   : > { %p703_p0 = scmp.lt.s32.totalorder %s499_s14, 3  ;;  %p704_p1 = scmp.ge.s32.totalorder %s499_s14, 1 }
  0x2f   : > { %p131_p3 = pnand %p704_p1, %p703_p0 }
  0x30   : > { %s627_s25 = sand.u32 (!%p131_p3), 1, %s491_s12  }
  0x31   : > { %134 = sbr.rel (%p131_p3) target bundleno = 243 (0xf3), region = 28  ;;  %s315_s26 = sshll.u32 (!%p131_p3), %s627_s25, 3 }
  0x32   : > { %s137_s27 = scalar_lea.sflag (!%p131_p3), [#allocation4], %s627_s25  ;;  %s140_s28 = scalar_lea.vmem (!%p131_p3), [#allocation3], %s315_s26 }
  0x38   : > { %478 = dma.done.wait (%p565_p6), %s137_s27, 128  }
  0x39   : > { %480 = vsyncadd (%p565_p6), %s137_s27, 4294967168  ;;  %s637_s29 = sld [smem:[#allocation2]]  ;;  %vm165_vm0 = vcmask 1043456   ;;  %v161_v0 = vld [vmem:[%s140_s28] sm:$0xff]  ;;  %v502_v33 = vmov 0.0   ;;  %s327_s3 = sshll.u32 %s543_s0, 7 }
  0x3a   : > { %v163_v1 = vcombine.high %v161_v0, %v161_v0  ;;  %v166_v2 = vsel %vm165_vm0, %v161_v0, 0.0  ;;  %s160_s4 = scalar_lea.vmem [#allocation6], %s315_s26  ;;  %s650_s8 = scalar_lea.hbm %s696_s2, %s327_s3 }
  0x3b   : > { %v167_v3 = vrot.slane %v166_v2, 4  ;;  %s238_s5 = sshll.u32 %s160_s4, 4  ;;  %s224_s9 = scalar_lea.sflag [#allocation5], %s627_s25  ;;  %s652_s5 = int_to_ptr.vmem [resolvable:$true] %s238_s5 }
  0x3c   : > { %v173_v4 = vsel %vm165_vm0, %v163_v1, 0.0  ;;  %s433_s10 = scalar_lea.vmem %s652_s5, 128  ;;  %p705_p12 = scmp.ne.s32.totalorder %s700_s22, 0 }
  0x3d   : > { %v168_v5 = vadd.f32 %v167_v3, %v166_v2  ;;  %v174_v6 = vrot.slane %v173_v4, 4  ;;  %p434_p6 = scmp.ne.s32.totalorder %s652_s5, %s433_s10  ;;  %s503_s0 = smov [#allocation6]  }
  0x3e   : > { %s437_s15 = sshll.u32 %s503_s0, 4  ;;  %s438_s15 = int_to_ptr.vmem [resolvable:$false] %s437_s15 }
  0x3f   : > { %p188_p11 = scmp.gt.f32.partialorder %s637_s29, 0.5  ;;  %v169_v7 = vrot.slane %v168_v5, 2  ;;  %v175_v8 = vadd.f32 %v174_v6, %v173_v4  ;;  %p435_p13 = pnand %p434_p6, %p705_p12 }
  0x40   : > { %s439_s17 = scalar_lea.vmem %s438_s15, 256  ;;  %p440_p10 = scmp.lt.s32.totalorder %s652_s5, %s438_s15 }
  0x41   : > { %v170_v9 = vadd.f32 %v169_v7, %v168_v5  ;;  %v176_v10 = vrot.slane %v175_v8, 2  ;;  %s330_s21 = scalar_select %p188_p11, 1, 0 }
  0x42   : > { %s358_s30 = scalar_select %p188_p11, 0, 1 }
  0x43   : > { %v171_v11 = vrot.slane %v170_v9, 1  ;;  %v177_v12 = vadd.f32 %v176_v10, %v175_v8  ;;  %v331_v27 = vstv %s330_s21  ;;  %p436_p7 = pneg %p435_p13  ;;  %p441_p2 = scmp.lt.s32.totalorder %s439_s17, %s433_s10 }
  0x44   : > { %v340_v29 = vstv %s358_s30  ;;  %vm332_vm1 = vcmp.ne.s32.totalorder %v331_v27, 0 }
  0x45   : > { %v172_v13 = vadd.f32 %v171_v11, %v170_v9  ;;  %v178_v14 = vrot.slane %v177_v12, 1  ;;  %vm341_vm4 = vcmp.ne.s32.totalorder %v340_v29, 0  ;;  %p442_p4 = por %p441_p2, %p440_p10 }
  0x47   : > { %v179_v15 = vadd.f32 %v178_v14, %v177_v12  ;;  %v181_v16 = vmul.f32 0.25, %v172_v13  ;;  %v319_v19 = vmul.f32 -0.25, %v172_v13  ;;  %p443_p5 = pnand %p442_p4, %p436_p7 }
  0x49   : > { %v182_v17 = vmul.f32 0.25, %v179_v15  ;;  %v320_v20 = vmul.f32 -0.25, %v179_v15  ;;  %v205_v21 = vmul.f32 1.442695, %v319_v19 }
  0x4b   : > { %v183_v18 = vmax.f32 %v181_v16, %v182_v17  ;;  %v207_v22 = vmul.f32 1.442695, %v320_v20  ;;  %395 = vpow2.f32 %v205_v21 }
  0x4d   : > { %184 = vmax.xlane.f32.xlu0 %v183_v18  ;;  %397 = vpow2.f32 %v207_v22 }
  0x55   : > { %v396_v23 = vpop.eup %395 }
  0x56   : > { %v209_v25 = vadd.f32 1.0, %v396_v23 }
  0x57   : > { %v398_v24 = vpop.eup %397 }
  0x58   : > { %v210_v26 = vadd.f32 1.0, %v398_v24  ;;  %399 = vrcp.f32 %v209_v25 }
  0x5a   : > { %401 = vrcp.f32 %v210_v26 }
  0x62   : > { %v400_v31 = vpop.eup %399 }
  0x64   : > { %v402_v32 = vpop.eup %401 }
  0xda   : > { %v185_v28 = vpop.xlane.xlu0 %184 }
  0xdb   : > { %v186_v30 = vmul.f32 0.8, %v185_v28 }
  0xdd   : > { %vm192_vm2 = vcmp.lt.f32.partialorder %v181_v16, %v186_v30  ;;  %vm193_vm3 = vcmp.lt.f32.partialorder %v182_v17, %v186_v30 }
  0xde   : > { %v317_v34 = vsel %vm192_vm2, 1.0, %v502_v33  ;;  %v318_v35 = vsel %vm193_vm3, 1.0, %v502_v33 }
  0xdf   : > { %v333_v36 = vsel %vm332_vm1, %v317_v34, 0  ;;  %v337_v37 = vsel %vm332_vm1, %v318_v35, 0 }
  0xe0   : > { %v342_v38 = vsel %vm341_vm4, %v400_v31, %v333_v36  ;;  %v346_v39 = vsel %vm341_vm4, %v402_v32, %v337_v37 }
  0xe1   : > { %v219_v40 = vcombine.low %v342_v38, %v346_v39 }
  0xe3   : > { %v221_v41 = vmul.f32 %v219_v40, %v161_v0 }
  0xe5   : > { %222 = vst [vmem:[%s160_s4] sm:$0xff] %v221_v41 }
  0xe6   : > { %446 = shalt.err (!%p443_p5)
}
  0xe7   : > { %s447_s18 = scalar_lea.hbm %s650_s8, 128  ;;  %s451_s25 = scalar_lea.hbm %s696_s2, 256 }
  0xe8   : > { %p448_p8 = scmp.ne.s32.totalorder %s650_s8, %s447_s18  ;;  %p452_p1 = scmp.lt.u32.totalorder %s650_s8, %s696_s2 }
  0xe9   : > { %p453_p3 = scmp.lt.u32.totalorder %s451_s25, %s447_s18  ;;  %p455_p6 = scmp.lt.u32.totalorder %s447_s18, %s650_s8 }
  0xea   : > { %p449_p9 = pnand %p448_p8, %p705_p12 }
  0xeb   : > { %p454_p11 = por %p453_p3, %p452_p1 }
  0xec   : > { %p450_p0 = pneg %p449_p9 }
  0xed   : > { %p456_p13 = por %p455_p6, %p454_p11 }
  0xef   : > { %p457_p7 = pnand %p456_p13, %p450_p0 }
  0xf1   : > { %460 = shalt.err (!%p457_p7)
}
  0xf2   : > { %347 = dma.vmem_to_hbm [thread:$0]  (%p705_p12), %s652_s5, 128, %s650_s8, %s224_s9  }
  0xf3 PF: > { %s250_s28 = sand.u32 1, %s487_s11   ;;  %p706_p10 = scmp.ne.s32.totalorder %s701_s23, 0 }
  0xf4   : > { %p707_p2 = scmp.ge.s32.totalorder %s499_s14, 2  ;;  %s251_s29 = scalar_lea.sflag [#allocation5], %s250_s28 }
  0xf6   : > { %p354_p4 = pnand %p707_p2, %p706_p10 }
  0xf8   : > { %482 = dma.done.wait (!%p354_p4), %s251_s29, 128  }
  0xf9   : > { %484 = vsyncadd (!%p354_p4), %s251_s29, 4294967168  ;;  %p16_p5 = scmp.ge.s32.totalorder %s547_s16, 4   ;;  %s708_s11 = smov %s491_s12 }
  0xfa   : > { %s709_s12 = smov %s495_s13  ;;  %s710_s13 = smov %s559_s19 }
  0xfb   : > { %s711_s14 = smov %s547_s16  ;;  %18 = sbr.rel (!%p16_p5) target bundleno = 7 (0x7), region = 81 }
 0x102   :  { %256 = vsyncpa [#allocation4], 1 }
 0x103   :  { %258 = vsyncpa [#allocation4 + $0x1], 1 }
 0x104   :  { %259 = vsyncpa [#allocation5], 1 }
 0x105   :  { %261 = vsyncpa [#allocation5 + $0x1], 1 }

</bundles_post_ra>
